<compile_context>
chip_gen: v7x
topology: tpu7x:2x2x1
jax: 0.10.0
libtpu: 0.0.40
codegen_flags: <defaults>
</compile_context>

<pallas_src>
import jax
import jax.numpy as jnp
from jax.experimental import pallas as pl
from jax.experimental.pallas import tpu as pltpu


def _round_up(x, m):
    return ((x + m - 1) // m) * m


def _vmem_capacity_bytes():
    """Per-TensorCore VMEM capacity; conservative fallback if query fails."""
    try:
        info = pltpu.get_tpu_info()
        cap = getattr(info, "vmem_capacity_bytes", None)
        if cap:
            return int(cap)
    except Exception:
        pass
    return 64 * 1024 * 1024  # v7x per-core VMEM (smallest of v5e/v6e/v7x)


def _select_tiles(n, k, d_pad, tm_want, out_bytes, budget):
    """Pick (tm, tn) so the double-buffered working set fits `budget` bytes."""
    w_bytes = 2  # bf16 fused weights

    def footprint(tm, tn):
        return (2 * k * tn * w_bytes        # W tile, double-buffered
                + 2 * tn * 4                # bias tile, double-buffered
                + 2 * tm * 4                # x tile, double-buffered
                + 2 * tm * tn * out_bytes   # out tile, double-buffered
                + tm * k * 6                # f32 act + bf16-cast temporaries
                + k * 4)                    # div_full (whole, resident)

    # Row tile: multiple of 8, no larger than needed; once n is moderate, cap
    # it so the grid has >= 2 steps (megacore split on v7x).
    tm = min(tm_want, _round_up(max(n, 1), 8))
    if n > 64:
        tm = min(tm, _round_up(-(-n // 2), 8))
    tm = max(8, _round_up(tm, 8))

    # D tile: largest lane-multiple divisor of d_pad that fits the budget with
    # a modest row tile (common case: tn == d_pad, i.e. a single D tile).
    m128 = d_pad // 128
    tn = 128
    for dv in range(m128, 0, -1):
        if m128 % dv:
            continue
        cand = dv * 128
        if footprint(min(tm, 256), cand) <= budget:
            tn = cand
            break

    # Shrink the row tile if the chosen tn still blows the budget at full tm.
    while footprint(tm, tn) > budget and tm > 128:
        tm = max(128, _round_up(tm // 2, 8))

    return tm, tn, footprint(tm, tn)


def _real_embed_kernel(x_ref, div_ref, w_ref, b_ref, o_ref):
    # x_ref:   (tm, 1)   f32 row tile of flattened inputs
    # div_ref: (1, K)    f32 [+division, -division], zero padded (whole, VMEM)
    # w_ref:   (K, tn)   bf16/f32 [0.5*Wp^T ; 0.5*Wn^T] D-tile, zero padded
    # b_ref:   (1, tn)   f32 0.5*(bp+bn) D-tile, zero padded
    # o_ref:   (tm, tn)
    x = x_ref[...]
    # Multiply + clip in f32 on the VPU (v5e has no native bf16 VALU), then a
    # single cast to the weight dtype right before the MXU.
    act = jnp.clip(x * div_ref[...], 0.0, 1.0)                    # (tm, K) f32
    acc = jnp.dot(act.astype(w_ref.dtype), w_ref[...],
                  preferred_element_type=jnp.float32)             # (tm, tn) f32
    o_ref[...] = (acc + b_ref[...]).astype(o_ref.dtype)


def real_embedding(x, fused, *, tm=1024, out_dtype=jnp.float32):
    """x: (...,) float -> (..., dim), matching RealEmbedding.forward."""
    div_full = fused["div_full"]          # (1, K)       K = 2*R_pad
    w = fused["w"]                        # (K, D_pad)
    b = fused["b"]                        # (1, D_pad)
    d = fused["dim"]                      # true output dim

    k, d_pad = w.shape
    orig_shape = x.shape
    out_dtype = jnp.dtype(out_dtype)

    xf = x.reshape(-1, 1).astype(jnp.float32)                     # (N, 1)
    n = xf.shape[0]
    if n == 0:                                                    # empty input
        return jnp.zeros(orig_shape + (d,), out_dtype)

    capacity = _vmem_capacity_bytes()
    budget = capacity // 2                # headroom for compiler scratch etc.
    tm_eff, tn, footprint = _select_tiles(n, k, d_pad, tm,
                                          out_dtype.itemsize, budget)

    n_pad = _round_up(n, tm_eff)
    if n_pad != n:
        xf = jnp.pad(xf, ((0, n_pad - n), (0, 0)))                # act=0 rows

    grid = (d_pad // tn, n_pad // tm_eff)  # D tiles OUTER, row tiles INNER
    vmem_limit = int(min(capacity, max(2 * footprint, 32 * 1024 * 1024)))

    out = pl.pallas_call(
        _real_embed_kernel,
        out_shape=jax.ShapeDtypeStruct((n_pad, d_pad), out_dtype),
        grid_spec=pltpu.PrefetchScalarGridSpec(
            num_scalar_prefetch=0,
            grid=grid,
            in_specs=[
                # Pipelined row tile of the flattened input.
                pl.BlockSpec((tm_eff, 1), lambda j, i: (i, 0)),
                # Tiny invariant operand: whole array resident in VMEM.
                pl.BlockSpec(memory_space=pltpu.MemorySpace.VMEM),   # div_full
                # W / bias D-tiles: index depends only on the OUTER grid axis,
                # so each tile is fetched once and reused across all row tiles.
                pl.BlockSpec((k, tn), lambda j, i: (0, j)),          # W fused
                pl.BlockSpec((1, tn), lambda j, i: (0, j)),          # b fused
            ],
            # Lane-dense output tile (tn is a multiple of 128).
            out_specs=pl.BlockSpec((tm_eff, tn), lambda j, i: (i, j)),
        ),
        compiler_params=pltpu.CompilerParams(
            dimension_semantics=("parallel", "parallel"),
            vmem_limit_bytes=vmem_limit,
        ),
    )(xf, div_full, w, b)

    # Only pay the slice copy when padding was actually added.  The row slice
    # must stay whenever n_pad != n (padded rows hold bias-only values).
    if n_pad != n or d_pad != d:
        out = out[:n, :d]
    return out.reshape(orig_shape + (d,))


def make_params(key, dim, max_mag, resolution):
    """Deterministic synthetic parameters matching the PyTorch module's shapes."""
    kpw, kpb, knw, knb = jax.random.split(key, 4)
    bound = 1.0 / (resolution ** 0.5)
    # torch nn.Linear(resolution, dim): weight (dim, resolution), bias (dim,)
    wp = jax.random.uniform(kpw, (dim, resolution), jnp.float32, -bound, bound)
    bp = jax.random.uniform(kpb, (dim,), jnp.float32, -bound, bound)
    wn = jax.random.uniform(knw, (dim, resolution), jnp.float32, -bound, bound)
    bn = jax.random.uniform(knb, (dim,), jnp.float32, -bound, bound)
    # division = arange(resolution, 0, -1) / (max_v - min_v), min_v = 0
    division = (jnp.arange(resolution, 0, -1, dtype=jnp.float32) / max_mag)[None, :]
    return {"division": division, "wp": wp, "bp": bp, "wn": wn, "bn": bn}


def fuse_params(params, *, lane=128, weight_dtype=jnp.bfloat16):
    """Pre-fuse / pad params for the kernel (done once, off the hot path).

    - R is padded so 2*R_pad is a multiple of `lane` (lane-dense activation).
    - D is padded to a multiple of `lane` (lane-dense, unmasked output stores).
    - The 0.5 averaging and the bias sum are folded into the weights/bias.
    - The minus sign of the negative branch is folded into div_full.
    - Weights are stored in `weight_dtype` (bf16 default: native MXU rate,
      half the VMEM footprint; pass jnp.float32 for a bit-exact path).
    Padding is exact: padded division entries and weight rows/cols are 0.
    """
    division = params["division"]                       # (1, R)
    wp, bp = params["wp"], params["bp"]                 # (D, R), (D,)
    wn, bn = params["wn"], params["bn"]

    r = division.shape[-1]
    d = wp.shape[0]
    r_pad = _round_up(r, lane // 2)                     # 2*r_pad % lane == 0
    d_pad = _round_up(d, lane)

    div_pad = jnp.zeros((1, r_pad), jnp.float32).at[:, :r].set(division)
    div_full = jnp.concatenate([div_pad, -div_pad], axis=-1)      # (1, 2*r_pad)

    w = jnp.zeros((2 * r_pad, d_pad), jnp.float32)
    w = w.at[:r, :d].set(0.5 * wp.T)                    # positive branch rows
    w = w.at[r_pad:r_pad + r, :d].set(0.5 * wn.T)       # negative branch rows
    w = w.astype(weight_dtype)

    b = jnp.zeros((1, d_pad), jnp.float32).at[:, :d].set(0.5 * (bp + bn))

    return {"div_full": div_full, "w": w, "b": b, "dim": d}


def real_embedding_ref(x, params):
    """Pure-JAX reference mirroring the PyTorch forward exactly."""
    div = params["division"]
    xf = x.reshape(-1, 1)
    pos = jnp.clip(xf * div, 0.0, 1.0) @ params["wp"].T + params["bp"]
    neg = jnp.clip(-xf * div, 0.0, 1.0) @ params["wn"].T + params["bn"]
    out = (pos + neg) / 2.0
    return out.reshape(x.shape + (params["wp"].shape[0],))


if __name__ == "__main__":
    key = jax.random.PRNGKey(0)
    k_param, k_x = jax.random.split(key)

    B, S = 2, 8
    dim, max_mag, resolution = 32, 4.0, 16

    params = make_params(k_param, dim, max_mag, resolution)
    x = jax.random.uniform(k_x, (B, S), jnp.float32, -max_mag, max_mag)
    ref = real_embedding_ref(x, params)

    # 1) Bit-exact path (f32 weights) -- semantics check against the reference.
    fused_f32 = fuse_params(params, weight_dtype=jnp.float32)
    out_f32 = jax.block_until_ready(real_embedding(x, fused_f32))
    assert out_f32.shape == (B, S, dim), out_f32.shape
    assert jnp.allclose(out_f32, ref, atol=1e-5, rtol=1e-5), "f32 path mismatch"

    # 2) Default fast path: bf16 weights / bf16 MXU, f32 accumulation + output.
    fused = fuse_params(params)
    out = jax.block_until_ready(real_embedding(x, fused))
    assert out.shape == (B, S, dim), out.shape
    assert jnp.allclose(out, ref, atol=5e-2, rtol=5e-2), "bf16 path mismatch"

    # 3) bf16 output variant (halves HBM writeback for bf16 consumers).
    out_bf16 = jax.block_until_ready(
        real_embedding(x, fused, out_dtype=jnp.bfloat16))
    assert out_bf16.dtype == jnp.bfloat16
    assert jnp.allclose(out_bf16.astype(jnp.float32), ref,
                        atol=8e-2, rtol=8e-2), "bf16-out path mismatch"

    print("KERNEL_OK")
</pallas_src>

<mosaic_0001>
module attributes {stable_mosaic.version = 11 : i64} {
  func.func @_real_embed_kernel(%arg0: i32, %arg1: i32, %arg2: memref<16x1xf32, #tpu.memory_space<vmem>>, %arg3: memref<1x128xf32, #tpu.memory_space<vmem>>, %arg4: memref<128x128xf32, #tpu.memory_space<vmem>>, %arg5: memref<1x128xf32, #tpu.memory_space<vmem>>, %arg6: memref<16x128xf32, #tpu.memory_space<vmem>>) attributes {dimension_semantics = [#tpu.dimension_semantics<parallel>, #tpu.dimension_semantics<parallel>], iteration_bounds = array<i64: 1, 1>, scalar_prefetch = 0 : i64, scratch_operands = 0 : i64, tpu.core_type = #tpu.core_type<tc>, window_params = [{transform_indices = @transform_0, window_bounds = array<i64: 16, 1>}, {pipeline_mode = #tpu.pipeline_mode<synchronous>, transform_indices = @transform_1, window_bounds = array<i64: 1, 128>}, {transform_indices = @transform_2, window_bounds = array<i64: 128, 128>}, {transform_indices = @transform_3, window_bounds = array<i64: 1, 128>}, {transform_indices = @transform_4, window_bounds = array<i64: 16, 128>}]} {
    %c0 = arith.constant 0 : index
    %c0_0 = arith.constant 0 : index
    %0 = vector.load %arg2[%c0, %c0_0] : memref<16x1xf32, #tpu.memory_space<vmem>>, vector<16x1xf32>
    %c0_1 = arith.constant 0 : index
    %c0_2 = arith.constant 0 : index
    %1 = vector.load %arg3[%c0_1, %c0_2] : memref<1x128xf32, #tpu.memory_space<vmem>>, vector<1x128xf32>
    %2 = vector.broadcast %0 : vector<16x1xf32> to vector<16x128xf32>
    %3 = vector.broadcast %1 : vector<1x128xf32> to vector<16x128xf32>
    %4 = arith.mulf %2, %3 : vector<16x128xf32>
    %cst = arith.constant 0.000000e+00 : f32
    %cst_3 = arith.constant 1.000000e+00 : f32
    %5 = vector.broadcast %cst : f32 to vector<16x128xf32>
    %6 = arith.maximumf %5, %4 : vector<16x128xf32>
    %7 = vector.broadcast %cst_3 : f32 to vector<16x128xf32>
    %8 = arith.minimumf %7, %6 : vector<16x128xf32>
    %c0_4 = arith.constant 0 : index
    %c0_5 = arith.constant 0 : index
    %9 = vector.load %arg4[%c0_4, %c0_5] : memref<128x128xf32, #tpu.memory_space<vmem>>, vector<128x128xf32>
    %cst_6 = arith.constant dense<0.000000e+00> : vector<16x128xf32>
    %10 = tpu.matmul %8, %9, %cst_6 {dimension_numbers = #tpu.dot_dimension_numbers<[1], [0], [0], [1], [0, 0, 1, 1], [], []>} : vector<16x128xf32>, vector<128x128xf32>, vector<16x128xf32> -> vector<16x128xf32>
    %c0_7 = arith.constant 0 : index
    %c0_8 = arith.constant 0 : index
    %11 = vector.load %arg5[%c0_7, %c0_8] : memref<1x128xf32, #tpu.memory_space<vmem>>, vector<1x128xf32>
    %12 = vector.broadcast %11 : vector<1x128xf32> to vector<16x128xf32>
    %13 = arith.addf %10, %12 : vector<16x128xf32>
    %c0_9 = arith.constant 0 : index
    %c0_10 = arith.constant 0 : index
    %14 = vector.load %arg6[%c0_9, %c0_10] : memref<16x128xf32, #tpu.memory_space<vmem>>, vector<16x128xf32>
    tpu.vector_store %arg6[%c0_9, %c0_10], %13 {strides = array<i32>} : memref<16x128xf32, #tpu.memory_space<vmem>>, vector<16x128xf32>,
    return
  }
  func.func @transform_0(%arg0: i32, %arg1: i32) -> (i32, i32) {
    %c0_i32 = arith.constant 0 : i32
    %c0_i32_0 = arith.constant 0 : i32
    return %arg1, %c0_i32 : i32, i32
  }
  func.func @transform_1(%arg0: i32, %arg1: i32) -> (i32, i32) {
    %c0_i32 = arith.constant 0 : i32
    %c0_i32_0 = arith.constant 0 : i32
    %c0_i32_1 = arith.constant 0 : i32
    return %c0_i32, %c0_i32_0 : i32, i32
  }
  func.func @transform_2(%arg0: i32, %arg1: i32) -> (i32, i32) {
    %c0_i32 = arith.constant 0 : i32
    %c0_i32_0 = arith.constant 0 : i32
    return %c0_i32, %arg0 : i32, i32
  }
  func.func @transform_3(%arg0: i32, %arg1: i32) -> (i32, i32) {
    %c0_i32 = arith.constant 0 : i32
    %c0_i32_0 = arith.constant 0 : i32
    return %c0_i32, %arg0 : i32, i32
  }
  func.func @transform_4(%arg0: i32, %arg1: i32) -> (i32, i32) {
    %c0_i32 = arith.constant 0 : i32
    return %arg1, %arg0 : i32, i32
  }
}

</mosaic_0001>

<bundles_post_ra>
// kernel: tpu_custom_call.1
= control target key start
LH: loop header
LB: loop body
LE: loop exit
PB: predicated region body
PF: predicated region fallthrough
CT: control target
= control target key end

     0   :  { %9 = vsyncpa [#allocation3], 0  ;;  %s387_s0 = inlined_call_operand.vmem [shape: f32[16,1], index: 0, kind: input, shape index: {}]   ;;  %s388_s1 = inlined_call_operand.vmem [shape: f32[1,128], index: 1, kind: input, shape index: {}]   ;;  %s389_s2 = inlined_call_operand.hbm [shape: f32[128,128], index: 2, kind: input, shape index: {}]   ;;  %s390_s3 = inlined_call_operand.vmem [shape: f32[1,128], index: 3, kind: input, shape index: {}]   ;;  %s391_s4 = inlined_call_operand.hbm [shape: f32[16,128], index: 4, kind: output, shape index: {}]  }
   0x1   :  { %10 = vsyncpa [#allocation4], 0  ;;  %s315_s15 = smov [#allocation2]   ;;  %s267_s19 = scalar_lea.hbm %s389_s2, 2048 }
   0x2   :  { %s20_s16 = sshll.u32 %s315_s15, 4  ;;  %p268_p0 = scmp.ne.s32.totalorder %s389_s2, %s267_s19  ;;  %s21_s16 = int_to_ptr.vmem [resolvable:$true] %s20_s16 }
   0x3   :  { %p271_p1 = scmp.lt.u32.totalorder %s267_s19, %s389_s2 }
   0x5   :  { %p273_p2 = pnand %p271_p1, %p268_p0 }
   0x7   :  { %276 = shalt.err (!%p273_p2)
}
   0x8   :  { %s277_s24 = scalar_lea.vmem %s21_s16, 2048  ;;  %p282_p4 = scmp.lt.s32.totalorder %s21_s16, %s21_s16 }
   0x9   :  { %p278_p3 = scmp.ne.s32.totalorder %s21_s16, %s277_s24  ;;  %p283_p5 = scmp.lt.s32.totalorder %s277_s24, %s277_s24 }
   0xb   :  { %p284_p6 = por %p283_p5, %p282_p4 }
   0xd   :  { %p285_p7 = pnand %p284_p6, %p278_p3 }
   0xf   :  { %288 = shalt.err (!%p285_p7)
}
  0x10   :  { %s316_s25 = smov 128   ;;  %s317_s26 = smov 8  }
  0x11   :  { %26 = dma.hbm_to_vmem [thread:$0]  %s389_s2, 2048, %s21_s16, [#allocation3], %s316_s25, %s316_s25, %s317_s26  }
  0x12   :  { %311 = dma.done.wait [#allocation3], 2048  }
  0x13   :  { %312 = vsyncadd [#allocation3], 4294965248  ;;  %v318_v0 = vmov 0   ;;  %v32_v1 = vld [vmem:[%s387_s0] sm:$0xff]  ;;  %v57_v2 = vld [vmem:[#allocation2] sm:$0xff]  ;;  %s319_s9 = smov [#allocation5]  }
  0x14   :  { %266 = vset.pattern.permute.xlu0 %v318_v0  ;;  %v58_v3 = vld [vmem:[#allocation2 + $0x8] sm:$0xff]  ;;  %v59_v4 = vld [vmem:[#allocation2 + $0x10] sm:$0xff]  ;;  %v60_v5 = vld [vmem:[#allocation2 + $0x18] sm:$0xff]  ;;  %s162_s10 = sshll.u32 %s319_s9, 4  ;;  %s163_s10 = int_to_ptr.vmem [resolvable:$true] %s162_s10 }
  0x15   :  { %37 = vperm.xlu0 %266, %v32_v1   ;;  %v33_v6 = vld [vmem:[%s387_s0 + $0x8] sm:$0xff]  ;;  %v229_v7 = vpack.c.bf16 %v58_v3, %v57_v2  ;;  %v233_v8 = vpack.c.bf16 %v60_v5, %v59_v4  ;;  %v61_v9 = vld [vmem:[#allocation2 + $0x20] sm:$0xff]  ;;  %v62_v10 = vld [vmem:[#allocation2 + $0x28] sm:$0xff]  ;;  %p294_p9 = scmp.lt.s32.totalorder %s163_s10, %s163_s10 }
  0x16   :  { %v237_v11 = vpack.c.bf16 %v62_v10, %v61_v9  ;;  %v63_v12 = vld [vmem:[#allocation2 + $0x30] sm:$0xff]  ;;  %v64_v13 = vld [vmem:[#allocation2 + $0x38] sm:$0xff]  ;;  %v65_v15 = vld [vmem:[#allocation2 + $0x40] sm:$0xff] }
  0x17   :  { %230 = vmatprep.subr.bf16.mxu0 %v229_v7  ;;  %v241_v14 = vpack.c.bf16 %v64_v13, %v63_v12  ;;  %v66_v16 = vld [vmem:[#allocation2 + $0x48] sm:$0xff]  ;;  %v67_v18 = vld [vmem:[#allocation2 + $0x50] sm:$0xff]  ;;  %v68_v19 = vld [vmem:[#allocation2 + $0x58] sm:$0xff] }
  0x18   :  { %232 = vmatpush3.bf16.msra.mxu0 %v229_v7  ;;  %v245_v17 = vpack.c.bf16 %v66_v16, %v65_v15  ;;  %v249_v20 = vpack.c.bf16 %v68_v19, %v67_v18  ;;  %v69_v21 = vld [vmem:[#allocation2 + $0x60] sm:$0xff]  ;;  %v70_v22 = vld [vmem:[#allocation2 + $0x68] sm:$0xff]  ;;  %v71_v24 = vld [vmem:[#allocation2 + $0x70] sm:$0xff] }
  0x19   :  { %42 = vperm.xlu0 %266, %v33_v6   ;;  %234 = vmatprep.subr.bf16.mxu0 %v233_v8  ;;  %v253_v23 = vpack.c.bf16 %v70_v22, %v69_v21  ;;  %v72_v25 = vld [vmem:[#allocation2 + $0x78] sm:$0xff]  ;;  %v174_v27 = vld [vmem:[%s388_s1] ss:$0 sm:$0xff]  ;;  %s289_s1 = scalar_lea.vmem %s163_s10, 256 }
  0x1a   :  { %v257_v26 = vpack.c.bf16 %v72_v25, %v71_v24  ;;  %v175_v36 = vld [vmem:[%s390_s3] ss:$0 sm:$0xff]  ;;  %p290_p8 = scmp.ne.s32.totalorder %s163_s10, %s289_s1  ;;  %p295_p10 = scmp.lt.s32.totalorder %s289_s1, %s289_s1 }
  0x1c   :  { %236 = vmatpush3.bf16.msra.mxu0 %v233_v8  ;;  %p296_p11 = por %p295_p10, %p294_p9 }
  0x1d   :  { %238 = vmatprep.subr.bf16.mxu0 %v237_v11 }
  0x1e   :  { %p297_p12 = pnand %p296_p11, %p290_p8 }
  0x20   :  { %240 = vmatpush3.bf16.msra.mxu0 %v237_v11 }
  0x21   :  { %242 = vmatprep.subr.bf16.mxu0 %v241_v14 }
  0x24   :  { %244 = vmatpush3.bf16.msra.mxu0 %v241_v14 }
  0x25   :  { %246 = vmatprep.subr.bf16.mxu0 %v245_v17 }
  0x28   :  { %248 = vmatpush3.bf16.msra.mxu0 %v245_v17 }
  0x29   :  { %250 = vmatprep.subr.bf16.mxu0 %v249_v20 }
  0x2c   :  { %252 = vmatpush3.bf16.msra.mxu0 %v249_v20 }
  0x2d   :  { %254 = vmatprep.subr.bf16.mxu0 %v253_v23 }
  0x30   :  { %256 = vmatpush3.bf16.msra.mxu0 %v253_v23 }
  0x31   :  { %258 = vmatprep.subr.bf16.mxu0 %v257_v26 }
  0x34   :  { %260 = vmatpush3.bf16.msra.mxu0 %v257_v26 }
  0x94   :  { %v38_v28 = vpop.permute.xlu0 %37 }
  0x95   :  { %v51_v29 = vmul.f32 %v174_v27, %v38_v28 }
  0x97   :  { %v53_v30 = vmax.f32 %v51_v29, 0.0 }
  0x98   :  { %v43_v31 = vpop.permute.xlu0 %42 }
  0x99   :  { %v52_v32 = vmul.f32 %v174_v27, %v43_v31  ;;  %v55_v33 = vmin.f32 %v53_v30, 1.0 }
  0x9b   :  { %v54_v34 = vmax.f32 %v52_v32, 0.0  ;;  %226 = vmatprep.mubr.f32.mxu0 %v55_v33 }
  0x9d   :  { %v56_v35 = vmin.f32 %v54_v34, 1.0 }
  0x9f   :  { %227 = vmatmul.mubr.f32.vlgmr.msra.gmra.mrb[0].mxu0 %v56_v35 }
 0x172   :  { %v228_v37 = vpop.f32.mrb[0].mxu0 }
 0x173   :  { %v152_v38 = vadd.f32 %v228_v37, %v175_v36  ;;  %v146_v39 = vpop.f32.mrb[1].mxu0 }
 0x174   :  { %v147_v40 = vadd.f32 %v175_v36, %v146_v39 }
 0x175   :  { %156 = vst [vmem:[#allocation5 + $0x8] sm:$0xff] %v152_v38 }
 0x176   :  { %155 = vst [vmem:[#allocation5] sm:$0xff] %v147_v40 }
 0x177   :  { %300 = shalt.err (!%p297_p12)
}
 0x178   :  { %s301_s3 = scalar_lea.hbm %s391_s4, 256 }
 0x179   :  { %p302_p13 = scmp.ne.s32.totalorder %s391_s4, %s301_s3  ;;  %p305_p0 = scmp.lt.u32.totalorder %s301_s3, %s391_s4 }
 0x17b   :  { %p307_p1 = pnand %p305_p0, %p302_p13 }
 0x17d   :  { %310 = shalt.err (!%p307_p1)
}
 0x17e   :  { %168 = dma.vmem_to_hbm [thread:$0]  %s163_s10, 256, %s391_s4, [#allocation4], %s316_s25, %s316_s25, %s317_s26  }
 0x17f   :  { %313 = dma.done.wait [#allocation4], 256  }
 0x180   :  { %314 = vsyncadd [#allocation4], 4294967040 }
 0x181   :  { %172 = vsyncpa [#allocation3], 1 }
 0x182   :  { %173 = vsyncpa [#allocation4], 1 }

</bundles_post_ra>
